<compile_context>
chip_gen: v7x
topology: tpu7x:2x2x1
jax: 0.10.0
libtpu: 0.0.40
codegen_flags: <defaults>
</compile_context>

<pallas_src>
import functools

import jax
import jax.numpy as jnp
from jax.experimental import pallas as pl
from jax.experimental.pallas import tpu as pltpu


def _round_up(x, m):
    return ((x + m - 1) // m) * m


def _sigmoid(x):
    # Single-EUP sigmoid: avoids exp + full-precision divide.
    return 0.5 * (jnp.tanh(0.5 * x) + 1.0)


def _binary_tree_gru_kernel(hl_ref, hr_ref,
                            w1_l_ref, w1_r_ref, b1_ref,
                            w2_l_ref, w2_r_ref, b2_ref,
                            out_ref, *, hp, matmul_dtype):
    hl_io = hl_ref[...]                                   # (TM, Hp) io dtype
    hr_io = hr_ref[...]
    hl = hl_io.astype(jnp.float32)                        # elementwise math in f32
    hr = hr_io.astype(jnp.float32)
    hl_m = hl_io.astype(matmul_dtype)                     # no-op when io is bf16
    hr_m = hr_io.astype(matmul_dtype)

    # fc1: cat([hl, hr]) @ W1 + b1, with W1 split per input half and the three
    # gate outputs fused along N -> one (Hp, 3Hp) weight per half.
    v = (jnp.dot(hl_m, w1_l_ref[...], preferred_element_type=jnp.float32)
         + jnp.dot(hr_m, w1_r_ref[...], preferred_element_type=jnp.float32)
         + b1_ref[...])                                   # (TM, 3Hp) f32
    i_gate = v[:, 0 * hp:1 * hp]                          # lane-aligned slices
    f_gate = v[:, 1 * hp:2 * hp]
    r_gate = v[:, 2 * hp:3 * hp]

    s_r = _sigmoid(r_gate)
    hl_r = (hl * s_r).astype(matmul_dtype)
    hr_r = (hr * s_r).astype(matmul_dtype)
    h_hat = (jnp.dot(hl_r, w2_l_ref[...], preferred_element_type=jnp.float32)
             + jnp.dot(hr_r, w2_r_ref[...], preferred_element_type=jnp.float32)
             + b2_ref[...])                               # (TM, Hp) f32

    h = (hl + hr) * _sigmoid(f_gate) + jnp.tanh(h_hat) * _sigmoid(i_gate)
    out_ref[...] = h.astype(out_ref.dtype)


def prepare_binary_tree_gru_params(w1, b1, w2, b2, *, matmul_dtype=jnp.bfloat16):
    """Pre-split / pad / cast the weights once (hoisted out of the per-call path).

    w1: (2H, 3H), b1: (3H,), w2: (2H, H), b2: (H,) -- (in, out) layout,
    i.e. transposed relative to torch.nn.Linear.weight.
    """
    two_h = w1.shape[0]
    H = two_h // 2
    Hp = _round_up(H, 128)

    def pad_w(w, n_blocks):
        # (H, n*H) -> (Hp, n*Hp): pad each H-wide output block to Hp.
        w = w.reshape(H, n_blocks, H)
        w = jnp.pad(w, ((0, Hp - H), (0, 0), (0, Hp - H)))
        return w.reshape(Hp, n_blocks * Hp).astype(matmul_dtype)

    def pad_b(b, n_blocks):
        b = b.reshape(n_blocks, H)
        b = jnp.pad(b, ((0, 0), (0, Hp - H)))
        return b.reshape(1, n_blocks * Hp).astype(jnp.float32)

    w1_l = pad_w(w1[:H], 3)        # left half of the concat, gates fused on N
    w1_r = pad_w(w1[H:], 3)
    b1p = pad_b(b1, 3)
    w2_l = pad_w(w2[:H], 1)
    w2_r = pad_w(w2[H:], 1)
    b2p = pad_b(b2, 1)
    return (H, (w1_l, w1_r, b1p, w2_l, w2_r, b2p))


def binary_tree_gru_apply(hl, hr, params, *, tile_m=None, out_dtype=None):
    """hl, hr: (B, L, H).  params: output of prepare_binary_tree_gru_params."""
    H, (w1_l, w1_r, b1p, w2_l, w2_r, b2p) = params
    matmul_dtype = w1_l.dtype
    Hp = w2_l.shape[0]

    B, L, h_in = hl.shape
    assert h_in == H, (h_in, H)
    M = B * L
    io_dtype = hl.dtype
    out_dtype = out_dtype if out_dtype is not None else io_dtype

    # Flatten rows; pad the feature axis to a lane-dense multiple of 128 only
    # when needed.  No row padding: ragged tail handled by boundary masking.
    hl2 = hl.reshape(M, H)
    hr2 = hr.reshape(M, H)
    if Hp != H:
        hl2 = jnp.pad(hl2, ((0, 0), (0, Hp - H)))
        hr2 = jnp.pad(hr2, ((0, 0), (0, Hp - H)))

    # ---- generation-aware tile_m / VMEM sizing -----------------------------
    try:
        vmem_cap = int(getattr(pltpu.get_tpu_info(), "vmem_capacity_bytes",
                               64 * 1024 * 1024))
    except Exception:
        vmem_cap = 64 * 1024 * 1024
    vmem_budget = int(0.80 * vmem_cap)       # headroom for compiler scratch

    mm_bytes = jnp.dtype(matmul_dtype).itemsize
    io_bytes = jnp.dtype(io_dtype).itemsize
    ot_bytes = jnp.dtype(out_dtype).itemsize
    # Resident weights + biases (double-buffered by the default pipeline).
    w_resident = 2 * (8 * Hp * Hp * mm_bytes + 4 * Hp * 4)
    # Per-row VMEM: double-buffered hl/hr/out tiles + ~14 f32 temporaries/row.
    per_row = 2 * Hp * (2 * io_bytes + ot_bytes) + 14 * Hp * 4
    budget_rows = max((int(0.75 * vmem_budget) - w_resident) // per_row, 16)

    if tile_m is None:
        tile_m = 2048
    tile_m = min(int(tile_m), int(budget_rows), _round_up(M, 16))
    tile_m = max((tile_m // 16) * 16, 16)
    # Keep >= 2 grid steps for large M so v7x's two TensorCores both get work.
    if M >= 1024 and -(-M // tile_m) < 2:
        tile_m = max(_round_up(-(-M // 2), 16), 16)
    grid_m = -(-M // tile_m)

    row_spec = pl.BlockSpec((tile_m, Hp), lambda m: (m, 0))
    w1_spec = pl.BlockSpec((Hp, 3 * Hp), lambda m: (0, 0))   # grid-invariant
    b1_spec = pl.BlockSpec((1, 3 * Hp), lambda m: (0, 0))
    w2_spec = pl.BlockSpec((Hp, Hp), lambda m: (0, 0))
    b2_spec = pl.BlockSpec((1, Hp), lambda m: (0, 0))

    kernel = functools.partial(_binary_tree_gru_kernel,
                               hp=Hp, matmul_dtype=matmul_dtype)

    cost = pl.CostEstimate(
        flops=16 * M * Hp * Hp,
        transcendentals=4 * M * Hp,
        bytes_accessed=(2 * M * Hp * io_bytes + M * Hp * ot_bytes
                        + 8 * Hp * Hp * mm_bytes + 16 * Hp),
    )

    out = pl.pallas_call(
        kernel,
        out_shape=jax.ShapeDtypeStruct((M, Hp), out_dtype),
        grid_spec=pltpu.PrefetchScalarGridSpec(
            num_scalar_prefetch=0,
            grid=(grid_m,),
            in_specs=[row_spec, row_spec,
                      w1_spec, w1_spec, b1_spec,
                      w2_spec, w2_spec, b2_spec],
            out_specs=row_spec,
        ),
        compiler_params=pltpu.CompilerParams(
            dimension_semantics=("parallel",),
            vmem_limit_bytes=vmem_budget),
        cost_estimate=cost,
    )(hl2, hr2, w1_l, w1_r, b1p, w2_l, w2_r, b2p)

    if Hp != H:
        out = out[:, :H]
    return out.reshape(B, L, H)


def binary_tree_gru(hl, hr, w1, b1, w2, b2, *,
                    tile_m=None, matmul_dtype=jnp.bfloat16, out_dtype=None):
    """Convenience one-shot API (prep + apply).  For an iteratively-applied
    tree layer, call prepare_binary_tree_gru_params once and reuse."""
    params = prepare_binary_tree_gru_params(w1, b1, w2, b2,
                                            matmul_dtype=matmul_dtype)
    return binary_tree_gru_apply(hl, hr, params,
                                 tile_m=tile_m, out_dtype=out_dtype)


def _reference(hl, hr, w1, b1, w2, b2):
    cat1 = jnp.concatenate([hl, hr], axis=-1)
    v = cat1 @ w1 + b1
    H = hl.shape[-1]
    i, f, r = v[..., :H], v[..., H:2 * H], v[..., 2 * H:]
    s_r = jax.nn.sigmoid(r)
    cat2 = jnp.concatenate([hl * s_r, hr * s_r], axis=-1)
    h_hat = cat2 @ w2 + b2
    return (hl + hr) * jax.nn.sigmoid(f) + jnp.tanh(h_hat) * jax.nn.sigmoid(i)


if __name__ == "__main__":
    B, L, H = 2, 8, 32
    key = jax.random.PRNGKey(0)
    k_hl, k_hr, k_w1, k_b1, k_w2, k_b2 = jax.random.split(key, 6)

    hl_f32 = jax.random.normal(k_hl, (B, L, H), dtype=jnp.float32)
    hr_f32 = jax.random.normal(k_hr, (B, L, H), dtype=jnp.float32)
    # Activations flow through the tree in bf16 (halves activation HBM traffic).
    hl = hl_f32.astype(jnp.bfloat16)
    hr = hr_f32.astype(jnp.bfloat16)

    # Deterministic parameter init (uniform, like torch Linear default scale).
    bound1 = 1.0 / (2 * H) ** 0.5
    w1 = jax.random.uniform(k_w1, (2 * H, 3 * H), jnp.float32, -bound1, bound1)
    b1 = jax.random.uniform(k_b1, (3 * H,), jnp.float32, -bound1, bound1)
    w2 = jax.random.uniform(k_w2, (2 * H, H), jnp.float32, -bound1, bound1)
    b2 = jax.random.uniform(k_b2, (H,), jnp.float32, -bound1, bound1)

    # Weight preprocessing hoisted out of the per-call path.
    params = prepare_binary_tree_gru_params(w1, b1, w2, b2)

    out = binary_tree_gru_apply(hl, hr, params)
    out = jax.block_until_ready(out)

    ref = _reference(hl.astype(jnp.float32), hr.astype(jnp.float32),
                     w1, b1, w2, b2)
    assert out.shape == (B, L, H)
    assert out.dtype == hl.dtype
    # bf16 activation I/O + bf16 MXU operands (f32 accumulation).
    assert jnp.allclose(out.astype(jnp.float32), ref, atol=5e-2, rtol=5e-2)
    print("KERNEL_OK")
</pallas_src>

<mosaic_0001>
module attributes {stable_mosaic.version = 11 : i64} {
  func.func @_binary_tree_gru_kernel(%arg0: i32, %arg1: memref<16x128xbf16, #tpu.memory_space<vmem>>, %arg2: memref<16x128xbf16, #tpu.memory_space<vmem>>, %arg3: memref<128x384xbf16, #tpu.memory_space<vmem>>, %arg4: memref<128x384xbf16, #tpu.memory_space<vmem>>, %arg5: memref<1x384xf32, #tpu.memory_space<vmem>>, %arg6: memref<128x128xbf16, #tpu.memory_space<vmem>>, %arg7: memref<128x128xbf16, #tpu.memory_space<vmem>>, %arg8: memref<1x128xf32, #tpu.memory_space<vmem>>, %arg9: memref<16x128xbf16, #tpu.memory_space<vmem>>) attributes {dimension_semantics = [#tpu.dimension_semantics<parallel>], iteration_bounds = array<i64: 1>, scalar_prefetch = 0 : i64, scratch_operands = 0 : i64, tpu.core_type = #tpu.core_type<tc>, window_params = [{transform_indices = @transform_0, window_bounds = array<i64: 16, 128>}, {transform_indices = @transform_1, window_bounds = array<i64: 16, 128>}, {pipeline_mode = #tpu.pipeline_mode<synchronous>, transform_indices = @transform_2, window_bounds = array<i64: 128, 384>}, {pipeline_mode = #tpu.pipeline_mode<synchronous>, transform_indices = @transform_3, window_bounds = array<i64: 128, 384>}, {pipeline_mode = #tpu.pipeline_mode<synchronous>, transform_indices = @transform_4, window_bounds = array<i64: 1, 384>}, {pipeline_mode = #tpu.pipeline_mode<synchronous>, transform_indices = @transform_5, window_bounds = array<i64: 128, 128>}, {pipeline_mode = #tpu.pipeline_mode<synchronous>, transform_indices = @transform_6, window_bounds = array<i64: 128, 128>}, {pipeline_mode = #tpu.pipeline_mode<synchronous>, transform_indices = @transform_7, window_bounds = array<i64: 1, 128>}, {transform_indices = @transform_8, window_bounds = array<i64: 16, 128>}]} {
    %c0 = arith.constant 0 : index
    %c0_0 = arith.constant 0 : index
    %0 = vector.load %arg1[%c0, %c0_0] : memref<16x128xbf16, #tpu.memory_space<vmem>>, vector<16x128xbf16>
    %c0_1 = arith.constant 0 : index
    %c0_2 = arith.constant 0 : index
    %1 = vector.load %arg2[%c0_1, %c0_2] : memref<16x128xbf16, #tpu.memory_space<vmem>>, vector<16x128xbf16>
    %2 = arith.extf %0 : vector<16x128xbf16> to vector<16x128xf32>
    %3 = arith.extf %1 : vector<16x128xbf16> to vector<16x128xf32>
    %c0_3 = arith.constant 0 : index
    %c0_4 = arith.constant 0 : index
    %4 = vector.load %arg3[%c0_3, %c0_4] : memref<128x384xbf16, #tpu.memory_space<vmem>>, vector<128x384xbf16>
    %cst = arith.constant dense<0.000000e+00> : vector<16x384xf32>
    %5 = tpu.matmul %0, %4, %cst {dimension_numbers = #tpu.dot_dimension_numbers<[1], [0], [0], [1], [0, 0, 1, 1], [], []>} : vector<16x128xbf16>, vector<128x384xbf16>, vector<16x384xf32> -> vector<16x384xf32>
    %c0_5 = arith.constant 0 : index
    %c0_6 = arith.constant 0 : index
    %6 = vector.load %arg4[%c0_5, %c0_6] : memref<128x384xbf16, #tpu.memory_space<vmem>>, vector<128x384xbf16>
    %cst_7 = arith.constant dense<0.000000e+00> : vector<16x384xf32>
    %7 = tpu.matmul %1, %6, %cst_7 {dimension_numbers = #tpu.dot_dimension_numbers<[1], [0], [0], [1], [0, 0, 1, 1], [], []>} : vector<16x128xbf16>, vector<128x384xbf16>, vector<16x384xf32> -> vector<16x384xf32>
    %8 = arith.addf %5, %7 : vector<16x384xf32>
    %c0_8 = arith.constant 0 : index
    %c0_9 = arith.constant 0 : index
    %9 = vector.load %arg5[%c0_8, %c0_9] : memref<1x384xf32, #tpu.memory_space<vmem>>, vector<1x384xf32>
    %10 = vector.broadcast %9 : vector<1x384xf32> to vector<16x384xf32>
    %11 = arith.addf %8, %10 : vector<16x384xf32>
    %12 = vector.extract_strided_slice %11 {offsets = [0, 0], sizes = [16, 128], strides = [1, 1]} : vector<16x384xf32> to vector<16x128xf32>
    %13 = vector.extract_strided_slice %11 {offsets = [0, 128], sizes = [16, 128], strides = [1, 1]} : vector<16x384xf32> to vector<16x128xf32>
    %14 = vector.extract_strided_slice %11 {offsets = [0, 256], sizes = [16, 128], strides = [1, 1]} : vector<16x384xf32> to vector<16x128xf32>
    %cst_10 = arith.constant 5.000000e-01 : f32
    %15 = vector.broadcast %cst_10 : f32 to vector<16x128xf32>
    %16 = arith.mulf %15, %14 : vector<16x128xf32>
    %17 = math.tanh %16 : vector<16x128xf32>
    %cst_11 = arith.constant 1.000000e+00 : f32
    %18 = vector.broadcast %cst_11 : f32 to vector<16x128xf32>
    %19 = arith.addf %17, %18 : vector<16x128xf32>
    %cst_12 = arith.constant 5.000000e-01 : f32
    %20 = vector.broadcast %cst_12 : f32 to vector<16x128xf32>
    %21 = arith.mulf %20, %19 : vector<16x128xf32>
    %22 = arith.mulf %2, %21 : vector<16x128xf32>
    %23 = arith.truncf %22 : vector<16x128xf32> to vector<16x128xbf16>
    %24 = arith.mulf %3, %21 : vector<16x128xf32>
    %25 = arith.truncf %24 : vector<16x128xf32> to vector<16x128xbf16>
    %c0_13 = arith.constant 0 : index
    %c0_14 = arith.constant 0 : index
    %26 = vector.load %arg6[%c0_13, %c0_14] : memref<128x128xbf16, #tpu.memory_space<vmem>>, vector<128x128xbf16>
    %cst_15 = arith.constant dense<0.000000e+00> : vector<16x128xf32>
    %27 = tpu.matmul %23, %26, %cst_15 {dimension_numbers = #tpu.dot_dimension_numbers<[1], [0], [0], [1], [0, 0, 1, 1], [], []>} : vector<16x128xbf16>, vector<128x128xbf16>, vector<16x128xf32> -> vector<16x128xf32>
    %c0_16 = arith.constant 0 : index
    %c0_17 = arith.constant 0 : index
    %28 = vector.load %arg7[%c0_16, %c0_17] : memref<128x128xbf16, #tpu.memory_space<vmem>>, vector<128x128xbf16>
    %cst_18 = arith.constant dense<0.000000e+00> : vector<16x128xf32>
    %29 = tpu.matmul %25, %28, %cst_18 {dimension_numbers = #tpu.dot_dimension_numbers<[1], [0], [0], [1], [0, 0, 1, 1], [], []>} : vector<16x128xbf16>, vector<128x128xbf16>, vector<16x128xf32> -> vector<16x128xf32>
    %30 = arith.addf %27, %29 : vector<16x128xf32>
    %c0_19 = arith.constant 0 : index
    %c0_20 = arith.constant 0 : index
    %31 = vector.load %arg8[%c0_19, %c0_20] : memref<1x128xf32, #tpu.memory_space<vmem>>, vector<1x128xf32>
    %32 = vector.broadcast %31 : vector<1x128xf32> to vector<16x128xf32>
    %33 = arith.addf %30, %32 : vector<16x128xf32>
    %34 = arith.addf %2, %3 : vector<16x128xf32>
    %cst_21 = arith.constant 5.000000e-01 : f32
    %35 = vector.broadcast %cst_21 : f32 to vector<16x128xf32>
    %36 = arith.mulf %35, %13 : vector<16x128xf32>
    %37 = math.tanh %36 : vector<16x128xf32>
    %cst_22 = arith.constant 1.000000e+00 : f32
    %38 = vector.broadcast %cst_22 : f32 to vector<16x128xf32>
    %39 = arith.addf %37, %38 : vector<16x128xf32>
    %cst_23 = arith.constant 5.000000e-01 : f32
    %40 = vector.broadcast %cst_23 : f32 to vector<16x128xf32>
    %41 = arith.mulf %40, %39 : vector<16x128xf32>
    %42 = arith.mulf %34, %41 : vector<16x128xf32>
    %43 = math.tanh %33 : vector<16x128xf32>
    %cst_24 = arith.constant 5.000000e-01 : f32
    %44 = vector.broadcast %cst_24 : f32 to vector<16x128xf32>
    %45 = arith.mulf %44, %12 : vector<16x128xf32>
    %46 = math.tanh %45 : vector<16x128xf32>
    %cst_25 = arith.constant 1.000000e+00 : f32
    %47 = vector.broadcast %cst_25 : f32 to vector<16x128xf32>
    %48 = arith.addf %46, %47 : vector<16x128xf32>
    %cst_26 = arith.constant 5.000000e-01 : f32
    %49 = vector.broadcast %cst_26 : f32 to vector<16x128xf32>
    %50 = arith.mulf %49, %48 : vector<16x128xf32>
    %51 = arith.mulf %43, %50 : vector<16x128xf32>
    %52 = arith.addf %42, %51 : vector<16x128xf32>
    %53 = arith.truncf %52 : vector<16x128xf32> to vector<16x128xbf16>
    %c0_27 = arith.constant 0 : index
    %c0_28 = arith.constant 0 : index
    %54 = vector.load %arg9[%c0_27, %c0_28] : memref<16x128xbf16, #tpu.memory_space<vmem>>, vector<16x128xbf16>
    tpu.vector_store %arg9[%c0_27, %c0_28], %53 {strides = array<i32>} : memref<16x128xbf16, #tpu.memory_space<vmem>>, vector<16x128xbf16>,
    return
  }
  func.func @transform_0(%arg0: i32) -> (i32, i32) {
    %c0_i32 = arith.constant 0 : i32
    %c0_i32_0 = arith.constant 0 : i32
    return %arg0, %c0_i32 : i32, i32
  }
  func.func @transform_1(%arg0: i32) -> (i32, i32) {
    %c0_i32 = arith.constant 0 : i32
    %c0_i32_0 = arith.constant 0 : i32
    return %arg0, %c0_i32 : i32, i32
  }
  func.func @transform_2(%arg0: i32) -> (i32, i32) {
    %c0_i32 = arith.constant 0 : i32
    %c0_i32_0 = arith.constant 0 : i32
    %c0_i32_1 = arith.constant 0 : i32
    return %c0_i32, %c0_i32_0 : i32, i32
  }
  func.func @transform_3(%arg0: i32) -> (i32, i32) {
    %c0_i32 = arith.constant 0 : i32
    %c0_i32_0 = arith.constant 0 : i32
    %c0_i32_1 = arith.constant 0 : i32
    return %c0_i32, %c0_i32_0 : i32, i32
  }
  func.func @transform_4(%arg0: i32) -> (i32, i32) {
    %c0_i32 = arith.constant 0 : i32
    %c0_i32_0 = arith.constant 0 : i32
    %c0_i32_1 = arith.constant 0 : i32
    return %c0_i32, %c0_i32_0 : i32, i32
  }
  func.func @transform_5(%arg0: i32) -> (i32, i32) {
    %c0_i32 = arith.constant 0 : i32
    %c0_i32_0 = arith.constant 0 : i32
    %c0_i32_1 = arith.constant 0 : i32
    return %c0_i32, %c0_i32_0 : i32, i32
  }
  func.func @transform_6(%arg0: i32) -> (i32, i32) {
    %c0_i32 = arith.constant 0 : i32
    %c0_i32_0 = arith.constant 0 : i32
    %c0_i32_1 = arith.constant 0 : i32
    return %c0_i32, %c0_i32_0 : i32, i32
  }
  func.func @transform_7(%arg0: i32) -> (i32, i32) {
    %c0_i32 = arith.constant 0 : i32
    %c0_i32_0 = arith.constant 0 : i32
    %c0_i32_1 = arith.constant 0 : i32
    return %c0_i32, %c0_i32_0 : i32, i32
  }
  func.func @transform_8(%arg0: i32) -> (i32, i32) {
    %c0_i32 = arith.constant 0 : i32
    %c0_i32_0 = arith.constant 0 : i32
    return %arg0, %c0_i32 : i32, i32
  }
}

</mosaic_0001>

<bundles_post_ra>
// kernel: tpu_custom_call.1
= control target key start
LH: loop header
LB: loop body
LE: loop exit
PB: predicated region body
PF: predicated region fallthrough
CT: control target
= control target key end

     0   :  { %13 = vsyncpa [#allocation3], 0  ;;  %s1631_s0 = inlined_call_operand.hbm [shape: bf16[16,128], index: 0, kind: input, shape index: {}]   ;;  %s1632_s1 = inlined_call_operand.hbm [shape: bf16[16,128], index: 1, kind: input, shape index: {}]   ;;  %s1633_s2 = inlined_call_operand.hbm [shape: bf16[128,384], index: 2, kind: input, shape index: {}]   ;;  %s1634_s3 = inlined_call_operand.hbm [shape: bf16[128,384], index: 3, kind: input, shape index: {}]   ;;  %s1635_s4 = inlined_call_operand.vmem [shape: f32[1,384], index: 4, kind: input, shape index: {}]   ;;  %s1636_s5 = inlined_call_operand.hbm [shape: bf16[128,128], index: 5, kind: input, shape index: {}]   ;;  %s1637_s6 = inlined_call_operand.hbm [shape: bf16[128,128], index: 6, kind: input, shape index: {}]   ;;  %s1638_s7 = inlined_call_operand.vmem [shape: f32[1,128], index: 7, kind: input, shape index: {}]   ;;  %s1639_s8 = inlined_call_operand.hbm [shape: bf16[16,128], index: 8, kind: output, shape index: {}]  }
   0x1   :  { %14 = vsyncpa [#allocation6], 0 }
   0x2   :  { %15 = vsyncpa [#allocation9], 0 }
   0x3   :  { %16 = vsyncpa [#allocation12], 0 }
   0x4   :  { %17 = vsyncpa [#allocation4], 0  ;;  %s1407_s27 = smov [#allocation5]   ;;  %s1243_s9 = scalar_lea.hbm %s1632_s1, 128 }
   0x5   :  { %s35_s28 = sshll.u32 %s1407_s27, 4  ;;  %p1244_p0 = scmp.ne.s32.totalorder %s1632_s1, %s1243_s9  ;;  %s36_s28 = int_to_ptr.vmem [resolvable:$true] %s35_s28 }
   0x6   :  { %p1247_p1 = scmp.lt.u32.totalorder %s1243_s9, %s1632_s1 }
   0x8   :  { %p1249_p2 = pnand %p1247_p1, %p1244_p0 }
   0xa   :  { %1252 = shalt.err (!%p1249_p2)
}
   0xb   :  { %s1253_s14 = scalar_lea.vmem %s36_s28, 128  ;;  %p1258_p4 = scmp.lt.s32.totalorder %s36_s28, %s36_s28 }
   0xc   :  { %p1254_p3 = scmp.ne.s32.totalorder %s36_s28, %s1253_s14  ;;  %p1259_p5 = scmp.lt.s32.totalorder %s1253_s14, %s1253_s14 }
   0xe   :  { %p1260_p6 = por %p1259_p5, %p1258_p4 }
  0x10   :  { %p1261_p7 = pnand %p1260_p6, %p1254_p3 }
  0x12   :  { %1264 = shalt.err (!%p1261_p7)
}
  0x13   :  { %s1408_s15 = smov 64   ;;  %s1409_s16 = smov 4  }
  0x14   :  { %41 = dma.hbm_to_vmem [thread:$0]  %s1632_s1, 128, %s36_s28, [#allocation6], %s1408_s15, %s1408_s15, %s1409_s16  }
  0x15   :  { %s1410_s19 = smov [#allocation8]   ;;  %s1411_s21 = smov [#allocation2]  }
  0x16   :  { %s59_s20 = sshll.u32 %s1410_s19, 4  ;;  %s23_s22 = sshll.u32 %s1411_s21, 4  ;;  %s60_s20 = int_to_ptr.vmem [resolvable:$true] %s59_s20  ;;  %s24_s22 = int_to_ptr.vmem [resolvable:$true] %s23_s22 }
  0x17   :  { %s1265_s25 = scalar_lea.hbm %s1634_s3, 3072 }
  0x18   :  { %p1266_p8 = scmp.ne.s32.totalorder %s1634_s3, %s1265_s25  ;;  %p1269_p9 = scmp.lt.u32.totalorder %s1265_s25, %s1634_s3 }
  0x1a   :  { %p1271_p10 = pnand %p1269_p9, %p1266_p8 }
  0x1c   :  { %1274 = shalt.err (!%p1271_p10)
}
  0x1d   :  { %s1275_s1 = scalar_lea.vmem %s60_s20, 3072  ;;  %p1280_p12 = scmp.lt.s32.totalorder %s60_s20, %s60_s20 }
  0x1e   :  { %p1276_p11 = scmp.ne.s32.totalorder %s60_s20, %s1275_s1  ;;  %p1281_p13 = scmp.lt.s32.totalorder %s1275_s1, %s1275_s1 }
  0x20   :  { %p1282_p0 = por %p1281_p13, %p1280_p12 }
  0x22   :  { %p1283_p1 = pnand %p1282_p0, %p1276_p11 }
  0x24   :  { %1286 = shalt.err (!%p1283_p1)
}
  0x25   :  { %s1412_s28 = smov 192   ;;  %s1413_s9 = smov 12  }
  0x26   :  { %65 = dma.hbm_to_vmem [thread:$0]  %s1634_s3, 3072, %s60_s20, [#allocation9], %s1412_s28, %s1412_s28, %s1413_s9  }
  0x27   :  { %s1287_s14 = scalar_lea.hbm %s1631_s0, 128 }
  0x28   :  { %p1288_p2 = scmp.ne.s32.totalorder %s1631_s0, %s1287_s14  ;;  %p1291_p3 = scmp.lt.u32.totalorder %s1287_s14, %s1631_s0 }
  0x2a   :  { %p1293_p4 = pnand %p1291_p3, %p1288_p2 }
  0x2c   :  { %1296 = shalt.err (!%p1293_p4)
}
  0x2d   :  { %s1297_s23 = scalar_lea.vmem %s24_s22, 128  ;;  %p1302_p6 = scmp.lt.s32.totalorder %s24_s22, %s24_s22 }
  0x2e   :  { %p1298_p5 = scmp.ne.s32.totalorder %s24_s22, %s1297_s23  ;;  %p1303_p7 = scmp.lt.s32.totalorder %s1297_s23, %s1297_s23 }
  0x30   :  { %p1304_p8 = por %p1303_p7, %p1302_p6 }
  0x32   :  { %p1305_p9 = pnand %p1304_p8, %p1298_p5 }
  0x34   :  { %1308 = shalt.err (!%p1305_p9)
}
  0x35   :  { %29 = dma.hbm_to_vmem [thread:$0]  %s1631_s0, 128, %s24_s22, [#allocation3], %s1408_s15, %s1408_s15, %s1409_s16  }
  0x36   :  { %s1414_s24 = smov [#allocation7]   ;;  %s1415_s26 = smov [#allocation10]  }
  0x37   :  { %s47_s25 = sshll.u32 %s1414_s24, 4  ;;  %s73_s27 = sshll.u32 %s1415_s26, 4  ;;  %s48_s25 = int_to_ptr.vmem [resolvable:$true] %s47_s25  ;;  %s74_s27 = int_to_ptr.vmem [resolvable:$true] %s73_s27 }
  0x38   :  { %s1309_s1 = scalar_lea.hbm %s1633_s2, 3072 }
  0x39   :  { %p1310_p10 = scmp.ne.s32.totalorder %s1633_s2, %s1309_s1  ;;  %p1313_p11 = scmp.lt.u32.totalorder %s1309_s1, %s1633_s2 }
  0x3b   :  { %p1315_p12 = pnand %p1313_p11, %p1310_p10 }
  0x3d   :  { %1318 = shalt.err (!%p1315_p12)
}
  0x3e   :  { %s1319_s0 = scalar_lea.vmem %s48_s25, 3072  ;;  %p1324_p0 = scmp.lt.s32.totalorder %s48_s25, %s48_s25 }
  0x3f   :  { %p1320_p13 = scmp.ne.s32.totalorder %s48_s25, %s1319_s0  ;;  %p1325_p1 = scmp.lt.s32.totalorder %s1319_s0, %s1319_s0 }
  0x41   :  { %p1326_p2 = por %p1325_p1, %p1324_p0 }
  0x43   :  { %p1327_p3 = pnand %p1326_p2, %p1320_p13 }
  0x45   :  { %1330 = shalt.err (!%p1327_p3)
}
  0x46   :  { %53 = dma.hbm_to_vmem [thread:$0]  %s1633_s2, 3072, %s48_s25, [#allocation6], %s1412_s28, %s1412_s28, %s1413_s9  }
  0x47   :  { %s1331_s19 = scalar_lea.hbm %s1636_s5, 1024 }
  0x48   :  { %p1332_p4 = scmp.ne.s32.totalorder %s1636_s5, %s1331_s19  ;;  %p1335_p5 = scmp.lt.u32.totalorder %s1331_s19, %s1636_s5 }
  0x4a   :  { %p1337_p6 = pnand %p1335_p5, %p1332_p4 }
  0x4c   :  { %1340 = shalt.err (!%p1337_p6)
}
  0x4d   :  { %s1341_s24 = scalar_lea.vmem %s74_s27, 1024  ;;  %p1346_p8 = scmp.lt.s32.totalorder %s74_s27, %s74_s27 }
  0x4e   :  { %p1342_p7 = scmp.ne.s32.totalorder %s74_s27, %s1341_s24  ;;  %p1347_p9 = scmp.lt.s32.totalorder %s1341_s24, %s1341_s24 }
  0x50   :  { %p1348_p10 = por %p1347_p9, %p1346_p8 }
  0x52   :  { %p1349_p11 = pnand %p1348_p10, %p1342_p7 }
  0x54   :  { %1352 = shalt.err (!%p1349_p11)
}
  0x55   :  { %79 = dma.hbm_to_vmem [thread:$0]  %s1636_s5, 1024, %s74_s27, [#allocation9], %s1408_s15, %s1408_s15, %s1409_s16  }
  0x56   :  { %s1416_s9 = smov [#allocation11]   ;;  %s1353_s30 = scalar_lea.hbm %s1637_s6, 1024 }
  0x57   :  { %s85_s25 = sshll.u32 %s1416_s9, 4  ;;  %p1354_p12 = scmp.ne.s32.totalorder %s1637_s6, %s1353_s30  ;;  %s86_s25 = int_to_ptr.vmem [resolvable:$true] %s85_s25 }
  0x58   :  { %p1357_p13 = scmp.lt.u32.totalorder %s1353_s30, %s1637_s6 }
  0x5a   :  { %p1359_p0 = pnand %p1357_p13, %p1354_p12 }
  0x5c   :  { %1362 = shalt.err (!%p1359_p0)
}
  0x5d   :  { %s1363_s13 = scalar_lea.vmem %s86_s25, 1024  ;;  %p1368_p2 = scmp.lt.s32.totalorder %s86_s25, %s86_s25 }
  0x5e   :  { %p1364_p1 = scmp.ne.s32.totalorder %s86_s25, %s1363_s13  ;;  %p1369_p3 = scmp.lt.s32.totalorder %s1363_s13, %s1363_s13 }
  0x60   :  { %p1370_p4 = por %p1369_p3, %p1368_p2 }
  0x62   :  { %p1371_p5 = pnand %p1370_p4, %p1364_p1 }
  0x64   :  { %1374 = shalt.err (!%p1371_p5)
}
  0x65   :  { %91 = dma.hbm_to_vmem [thread:$0]  %s1637_s6, 1024, %s86_s25, [#allocation12], %s1408_s15, %s1408_s15, %s1409_s16  }
  0x66   :  { %1397 = dma.done.wait [#allocation3], 128  }
  0x67   :  { %1398 = vsyncadd [#allocation3], 4294967168 }
  0x68   :  { %1399 = dma.done.wait [#allocation6], 3200  }
  0x69   :  { %1400 = vsyncadd [#allocation6], 4294964096 }
  0x6a   :  { %1401 = dma.done.wait [#allocation9], 4096  }
  0x6b   :  { %1402 = vsyncadd [#allocation9], 4294963200 }
  0x6c   :  { %1403 = dma.done.wait [#allocation12], 1024  }
  0x6d   :  { %1404 = vsyncadd [#allocation12], 4294966272  ;;  %v1417_v0 = vmov 0.0   ;;  %vm1418_vm0 = vmmov 0   ;;  %v1419_v1 = vmov 0   ;;  %v1566_v17 = vld [vmem:[#allocation5] sm:$0xff]  }
  0x6e   :  { %1045 = vmatprep.subr.bf16.mxu1 %v1417_v0  ;;  %1061 = vmatprep.mubr.msk.bf16.mxu1 %vm1418_vm0, %v1417_v0  ;;  %v1143_v2 = vld [vmem:[#allocation8 + $0x8] ss:$12 sps:$4 sm:$0xff]   ;;  %v1144_v3 = vld [vmem:[#allocation8 + $0x20] ss:$12 sps:$4 sm:$0xff]   ;;  %v1145_v4 = vld [vmem:[#allocation8 + $0x38] ss:$12 sps:$4 sm:$0xff]  }
  0x6f   :  { %351 = vmatprep.mubr.bf16.mxu0 %v1419_v1  ;;  %1046 = vmatpush3.bf16.msra.mxu1 %v1143_v2  ;;  %v1146_v5 = vld [vmem:[#allocation8 + $0x50] ss:$12 sps:$4 sm:$0xff]   ;;  %v1147_v6 = vld [vmem:[#allocation8 + $0x68] ss:$12 sps:$4 sm:$0xff]   ;;  %v1148_v7 = vld [vmem:[#allocation8 + $0x80] ss:$12 sps:$4 sm:$0xff]  }
  0x70   :  { %1047 = vmatprep.subr.bf16.mxu1 %v1417_v0  ;;  %v1161_v8 = vld [vmem:[#allocation8 + $0x4] ss:$12 sps:$4 sm:$0xff]   ;;  %v1163_v9 = vld [vmem:[#allocation8] ss:$12 sps:$4 sm:$0xff]   ;;  %v1164_v10 = vld [vmem:[#allocation8 + $0x1c] ss:$12 sps:$4 sm:$0xff]  }
  0x71   :  { %319 = vmatprep.subr.bf16.mxu0 %v1161_v8  ;;  %v1166_v11 = vld [vmem:[#allocation8 + $0x18] ss:$12 sps:$4 sm:$0xff]   ;;  %v1167_v12 = vld [vmem:[#allocation8 + $0x34] ss:$12 sps:$4 sm:$0xff]   ;;  %v1169_v14 = vld [vmem:[#allocation8 + $0x30] ss:$12 sps:$4 sm:$0xff]  }
  0x72   :  { %320 = vmatpush1.bf16.msra.mxu0 %v1163_v9  ;;  %v1149_v13 = vld [vmem:[#allocation8 + $0x98] ss:$12 sps:$4 sm:$0xff]   ;;  %v1150_v15 = vld [vmem:[#allocation8 + $0xb0] ss:$12 sps:$4 sm:$0xff]   ;;  %v1172_v18 = vld [vmem:[#allocation8 + $0x48] ss:$12 sps:$4 sm:$0xff]  }
  0x73   :  { %1048 = vmatpush3.bf16.msra.mxu1 %v1144_v3  ;;  %321 = vmatprep.subr.bf16.mxu0 %v1164_v10  ;;  %v1170_v16 = vld [vmem:[#allocation8 + $0x4c] ss:$12 sps:$4 sm:$0xff]   ;;  %v1173_v19 = vld [vmem:[#allocation8 + $0x64] ss:$12 sps:$4 sm:$0xff]   ;;  %v1152_v20 = vld [vmem:[#allocation7 + $0x8] ss:$12 sps:$4 sm:$0xff]   ;;  %v623_v3 = vlaneseq }
  0x74   :  { %1049 = vmatprep.subr.bf16.mxu1 %v1417_v0  ;;  %v1175_v21 = vld [vmem:[#allocation8 + $0x60] ss:$12 sps:$4 sm:$0xff]   ;;  %v1176_v22 = vld [vmem:[#allocation8 + $0x7c] ss:$12 sps:$4 sm:$0xff]   ;;  %v1178_v24 = vld [vmem:[#allocation8 + $0x78] ss:$12 sps:$4 sm:$0xff]  }
  0x75   :  { %v1153_v23 = vld [vmem:[#allocation7 + $0x20] ss:$12 sps:$4 sm:$0xff]   ;;  %v1154_v25 = vld [vmem:[#allocation7 + $0x38] ss:$12 sps:$4 sm:$0xff]   ;;  %v1181_v27 = vld [vmem:[#allocation8 + $0x90] ss:$12 sps:$4 sm:$0xff]  }
  0x76   :  { %322 = vmatpush1.bf16.msra.mxu0 %v1166_v11  ;;  %v1179_v26 = vld [vmem:[#allocation8 + $0x94] ss:$12 sps:$4 sm:$0xff]   ;;  %v1182_v28 = vld [vmem:[#allocation8 + $0xac] ss:$12 sps:$4 sm:$0xff]   ;;  %v1155_v29 = vld [vmem:[#allocation7 + $0x50] ss:$12 sps:$4 sm:$0xff]  }
  0x77   :  { %1050 = vmatpush3.bf16.msra.mxu1 %v1145_v4  ;;  %323 = vmatprep.subr.bf16.mxu0 %v1167_v12  ;;  %v1184_v30 = vld [vmem:[#allocation8 + $0xa8] ss:$12 sps:$4 sm:$0xff]   ;;  %v1187_v31 = vld [vmem:[#allocation7 + $0x4] ss:$12 sps:$4 sm:$0xff]   ;;  %v1185_v33 = vld [vmem:[#allocation7] ss:$12 sps:$4 sm:$0xff]  }
  0x78   :  { %1051 = vmatprep.subr.bf16.mxu1 %v1417_v0  ;;  %v1156_v32 = vld [vmem:[#allocation7 + $0x68] ss:$12 sps:$4 sm:$0xff]   ;;  %v1157_v35 = vld [vmem:[#allocation7 + $0x80] ss:$12 sps:$4 sm:$0xff]   ;;  %v1188_v36 = vld [vmem:[#allocation7 + $0x18] ss:$12 sps:$4 sm:$0xff]  }
  0x79   :  { %v1190_v34 = vld [vmem:[#allocation7 + $0x1c] ss:$12 sps:$4 sm:$0xff]   ;;  %v1193_v37 = vld [vmem:[#allocation7 + $0x34] ss:$12 sps:$4 sm:$0xff]   ;;  %v1158_v38 = vld [vmem:[#allocation7 + $0x98] ss:$12 sps:$4 sm:$0xff]  }
  0x7a   :  { %324 = vmatpush1.bf16.msra.mxu0 %v1169_v14  ;;  %v1191_v39 = vld [vmem:[#allocation7 + $0x30] ss:$12 sps:$4 sm:$0xff]   ;;  %v1196_v40 = vld [vmem:[#allocation7 + $0x4c] ss:$12 sps:$4 sm:$0xff]   ;;  %v1194_v43 = vld [vmem:[#allocation7 + $0x48] ss:$12 sps:$4 sm:$0xff]  }
  0x7b   :  { %1052 = vmatpush3.bf16.msra.mxu1 %v1146_v5  ;;  %325 = vmatprep.subr.bf16.mxu0 %v1170_v16  ;;  %v1581_v41 = vld [vmem:[#allocation2] sm:$0xff]   ;;  %v1197_v45 = vld [vmem:[#allocation7 + $0x60] ss:$12 sps:$4 sm:$0xff]   ;;  %v1202_v46 = vld [vmem:[#allocation7 + $0x7c] ss:$12 sps:$4 sm:$0xff]  }
  0x7c   :  { %1053 = vmatprep.subr.bf16.mxu1 %v1417_v0  ;;  %v1159_v42 = vld [vmem:[#allocation7 + $0xb0] ss:$12 sps:$4 sm:$0xff]   ;;  %v1200_v47 = vld [vmem:[#allocation7 + $0x78] ss:$12 sps:$4 sm:$0xff]   ;;  %v1205_v48 = vld [vmem:[#allocation7 + $0x94] ss:$12 sps:$4 sm:$0xff]  }
  0x7d   :  { %v1199_v44 = vld [vmem:[#allocation7 + $0x64] ss:$12 sps:$4 sm:$0xff]   ;;  %v1208_v50 = vld [vmem:[#allocation7 + $0xac] ss:$12 sps:$4 sm:$0xff]   ;;  %v1206_v51 = vld [vmem:[#allocation7 + $0xa8] ss:$12 sps:$4 sm:$0xff]  }
  0x7e   :  { %326 = vmatpush1.bf16.msra.mxu0 %v1172_v18  ;;  %v1203_v49 = vld [vmem:[#allocation7 + $0x90] ss:$12 sps:$4 sm:$0xff]   ;;  %v1209_v52 = vld [vmem:[#allocation11] sm:$0xff]   ;;  %v1211_v54 = vld [vmem:[#allocation11 + $0x8] sm:$0xff]  }
  0x7f   :  { %1054 = vmatpush3.bf16.msra.mxu1 %v1147_v6  ;;  %327 = vmatprep.subr.bf16.mxu0 %v1173_v19  ;;  %v1210_v53 = vld [vmem:[#allocation10] sm:$0xff]   ;;  %v1212_v55 = vld [vmem:[#allocation10 + $0x8] sm:$0xff]   ;;  %v1213_v56 = vld [vmem:[#allocation11 + $0x10] sm:$0xff]   ;;  %v624_v6 = vshrl.u32 %v623_v3, 7 }
  0x80   :  { %1055 = vmatprep.subr.bf16.mxu1 %v1417_v0  ;;  %v1214_v57 = vld [vmem:[#allocation10 + $0x10] sm:$0xff]   ;;  %v1215_v58 = vld [vmem:[#allocation11 + $0x18] sm:$0xff]   ;;  %v1217_v60 = vld [vmem:[#allocation11 + $0x20] sm:$0xff]  }
  0x81   :  { %v1216_v59 = vld [vmem:[#allocation10 + $0x18] sm:$0xff]   ;;  %v1218_v61 = vld [vmem:[#allocation10 + $0x20] sm:$0xff]   ;;  %v1219_v62 = vld [vmem:[#allocation11 + $0x28] sm:$0xff]   ;;  %v629_v10 = vsub.s32 1, %v624_v6  ;;  %v633_v16 = vsub.s32 2, %v624_v6 }
  0x82   :  { %328 = vmatpush1.bf16.msra.mxu0 %v1175_v21  ;;  %v1220_v63 = vld [vmem:[#allocation10 + $0x28] sm:$0xff]   ;;  %v1222_v2 = vld [vmem:[#allocation10 + $0x30] sm:$0xff]   ;;  %v1223_v4 = vld [vmem:[#allocation11 + $0x38] sm:$0xff]  }
  0x83   :  { %1056 = vmatpush3.bf16.msra.mxu1 %v1148_v7  ;;  %329 = vmatprep.subr.bf16.mxu0 %v1176_v22  ;;  %v1224_v5 = vld [vmem:[#allocation10 + $0x38] sm:$0xff]   ;;  %v625_v7 = vsub.s32 0, %v624_v6  ;;  %v621_v8 = vld [vmem:[%s1635_s4] sm:$0x7] }
  0x84   :  { %1057 = vmatprep.subr.bf16.mxu1 %v1417_v0  ;;  %v630_v11 = vrot.slane %v621_v8, %v629_v10  ;;  %v634_v18 = vrot.slane %v621_v8, %v633_v16 }
  0x85   :  { %v626_v9 = vrot.slane %v621_v8, %v625_v7 }
  0x86   :  { %330 = vmatpush1.bf16.msra.mxu0 %v1178_v24 }
  0x87   :  { %1058 = vmatpush3.bf16.msra.mxu1 %v1149_v13  ;;  %331 = vmatprep.subr.bf16.mxu0 %v1179_v26 }
  0x88   :  { %1059 = vmatprep.subr.bf16.mxu1 %v1417_v0 }
  0x8a   :  { %332 = vmatpush1.bf16.msra.mxu0 %v1181_v27 }
  0x8b   :  { %1060 = vmatpush3.bf16.msra.mxu1 %v1150_v15  ;;  %333 = vmatprep.subr.bf16.mxu0 %v1182_v28 }
  0x8c   :  { %1065 = vmatprep.subr.bf16.mxu1 %v1417_v0 }
  0x8e   :  { %1062 = vmatmul.mubr.bf16.vlgmr.msra.gmra.mrb[0].mxu1 %v1566_v17  ;;  %334 = vmatpush1.bf16.msra.mxu0 %v1184_v30 }
  0x8f   :  { %1066 = vmatpush3.bf16.msra.mxu1 %v1152_v20  ;;  %1081 = vmatprep.mubr.msk.bf16.mxu1 %vm1418_vm0, %v1417_v0 }
  0x90   :  { %1067 = vmatprep.subr.bf16.mxu1 %v1417_v0  ;;  %537 = vmatprep.subr.bf16.mxu0 %v1187_v31 }
  0x91   :  { %352 = vmatmul.mubr.bf16.vlgmr.msra.gmra.mrb[0].mxu0 %v1566_v17 }
  0x92   :  { %538 = vmatpush1.bf16.msra.mxu0 %v1185_v33  ;;  %569 = vmatprep.mubr.bf16.mxu0 %v1419_v1  ;;  %v1221_v1 = vld [vmem:[#allocation11 + $0x30] sm:$0xff]   ;;  %v118_v33 = vunpack.c.h.bf16 %v1581_v41 }
  0x93   :  { %1068 = vmatpush3.bf16.msra.mxu1 %v1153_v23  ;;  %539 = vmatprep.subr.bf16.mxu0 %v1190_v34  ;;  %v119_v34 = vunpack.c.l.bf16 %v1566_v17 }
  0x94   :  { %1069 = vmatprep.subr.bf16.mxu1 %v1417_v0 }
  0x96   :  { %540 = vmatpush1.bf16.msra.mxu0 %v1188_v36 }
  0x97   :  { %1070 = vmatpush3.bf16.msra.mxu1 %v1154_v25  ;;  %541 = vmatprep.subr.bf16.mxu0 %v1193_v37  ;;  %v120_v37 = vunpack.c.h.bf16 %v1566_v17 }
  0x98   :  { %1071 = vmatprep.subr.bf16.mxu1 %v1417_v0 }
  0x9a   :  { %542 = vmatpush1.bf16.msra.mxu0 %v1191_v39 }
  0x9b   :  { %1072 = vmatpush3.bf16.msra.mxu1 %v1155_v29  ;;  %543 = vmatprep.subr.bf16.mxu0 %v1196_v40 }
  0x9c   :  { %1073 = vmatprep.subr.bf16.mxu1 %v1417_v0 }
  0x9e   :  { %544 = vmatpush1.bf16.msra.mxu0 %v1194_v43 }
  0x9f   :  { %1074 = vmatpush3.bf16.msra.mxu1 %v1156_v32  ;;  %545 = vmatprep.subr.bf16.mxu0 %v1199_v44  ;;  %v117_v32 = vunpack.c.l.bf16 %v1581_v41 }
  0xa0   :  { %1075 = vmatprep.subr.bf16.mxu1 %v1417_v0 }
  0xa2   :  { %546 = vmatpush1.bf16.msra.mxu0 %v1197_v45 }
  0xa3   :  { %1076 = vmatpush3.bf16.msra.mxu1 %v1157_v35  ;;  %547 = vmatprep.subr.bf16.mxu0 %v1202_v46 }
  0xa4   :  { %1077 = vmatprep.subr.bf16.mxu1 %v1417_v0 }
  0xa6   :  { %548 = vmatpush1.bf16.msra.mxu0 %v1200_v47 }
  0xa7   :  { %1078 = vmatpush3.bf16.msra.mxu1 %v1158_v38  ;;  %549 = vmatprep.subr.bf16.mxu0 %v1205_v48 }
  0xa8   :  { %1079 = vmatprep.subr.bf16.mxu1 %v1417_v0 }
  0xaa   :  { %550 = vmatpush1.bf16.msra.mxu0 %v1203_v49 }
  0xab   :  { %1080 = vmatpush3.bf16.msra.mxu1 %v1159_v42  ;;  %551 = vmatprep.subr.bf16.mxu0 %v1208_v50 }
  0xac   :  { %1105 = vmatprep.subr.bf16.mxu1 %v1417_v0 }
  0xae   :  { %1082 = vmatmul.mubr.bf16.vlgmr.msra.gmra.mrb[4].mxu1 %v1581_v41  ;;  %552 = vmatpush1.bf16.msra.mxu0 %v1206_v51 }
  0xaf   :  { %1121 = vmatprep.mubr.msk.bf16.mxu1 %vm1418_vm0, %v1417_v0  ;;  %1085 = vmatprep.subr.bf16.mxu0 %v1417_v0 }
  0xb0   :  { %1106 = vmatpush3.bf16.msra.mxu1 %v1210_v53 }
  0xb1   :  { %570 = vmatmul.mubr.bf16.vlgmr.msra.gmra.mrb[0].mxu0 %v1581_v41  ;;  %1107 = vmatprep.subr.bf16.mxu1 %v1417_v0 }
  0xb2   :  { %1101 = vmatprep.mubr.msk.bf16.mxu0 %vm1418_vm0, %v1417_v0  ;;  %1086 = vmatpush3.bf16.msra.mxu0 %v1209_v52 }
  0xb3   :  { %1087 = vmatprep.subr.bf16.mxu0 %v1417_v0 }
  0xb4   :  { %1108 = vmatpush3.bf16.msra.mxu1 %v1212_v55 }
  0xb5   :  { %1109 = vmatprep.subr.bf16.mxu1 %v1417_v0 }
  0xb6   :  { %1088 = vmatpush3.bf16.msra.mxu0 %v1211_v54 }
  0xb7   :  { %1089 = vmatprep.subr.bf16.mxu0 %v1417_v0 }
  0xb8   :  { %1110 = vmatpush3.bf16.msra.mxu1 %v1214_v57  ;;  %v999_v57 = vld [vmem:[%s1638_s7] ss:$0 sm:$0xff]  ;;  %s1420_s7 = smov [#allocation13]  }
  0xb9   :  { %1111 = vmatprep.subr.bf16.mxu1 %v1417_v0  ;;  %s918_s14 = sshll.u32 %s1420_s7, 4  ;;  %s919_s14 = int_to_ptr.vmem [resolvable:$true] %s918_s14 }
  0xba   :  { %1090 = vmatpush3.bf16.msra.mxu0 %v1213_v56  ;;  %s1375_s17 = scalar_lea.vmem %s919_s14, 128  ;;  %p1380_p7 = scmp.lt.s32.totalorder %s919_s14, %s919_s14 }
  0xbb   :  { %1091 = vmatprep.subr.bf16.mxu0 %v1417_v0  ;;  %p1376_p6 = scmp.ne.s32.totalorder %s919_s14, %s1375_s17  ;;  %p1381_p8 = scmp.lt.s32.totalorder %s1375_s17, %s1375_s17 }
  0xbc   :  { %1112 = vmatpush3.bf16.msra.mxu1 %v1216_v59 }
  0xbd   :  { %1113 = vmatprep.subr.bf16.mxu1 %v1417_v0  ;;  %p1382_p9 = por %p1381_p8, %p1380_p7 }
  0xbe   :  { %1092 = vmatpush3.bf16.msra.mxu0 %v1215_v58 }
  0xbf   :  { %1093 = vmatprep.subr.bf16.mxu0 %v1417_v0  ;;  %p1383_p10 = pnand %p1382_p9, %p1376_p6 }
  0xc0   :  { %1114 = vmatpush3.bf16.msra.mxu1 %v1218_v61 }
  0xc1   :  { %1115 = vmatprep.subr.bf16.mxu1 %v1417_v0 }
  0xc2   :  { %1094 = vmatpush3.bf16.msra.mxu0 %v1217_v60 }
  0xc3   :  { %1095 = vmatprep.subr.bf16.mxu0 %v1417_v0 }
  0xc4   :  { %1116 = vmatpush3.bf16.msra.mxu1 %v1220_v63 }
  0xc5   :  { %1117 = vmatprep.subr.bf16.mxu1 %v1417_v0 }
  0xc6   :  { %1096 = vmatpush3.bf16.msra.mxu0 %v1219_v62 }
  0xc7   :  { %1097 = vmatprep.subr.bf16.mxu0 %v1417_v0 }
  0xc8   :  { %1118 = vmatpush3.bf16.msra.mxu1 %v1222_v2 }
  0xc9   :  { %1119 = vmatprep.subr.bf16.mxu1 %v1417_v0 }
  0xca   :  { %1098 = vmatpush3.bf16.msra.mxu0 %v1221_v1 }
  0xcb   :  { %1099 = vmatprep.subr.bf16.mxu0 %v1417_v0 }
  0xcc   :  { %1120 = vmatpush3.bf16.msra.mxu1 %v1224_v5 }
  0xce   :  { %1100 = vmatpush3.bf16.msra.mxu0 %v1223_v4 }
 0x161   :  { %v396_v12 = vpop.f32.mrb[0].mxu1 }
 0x162   :  { %v1063_v13 = vpop.f32.mrb[1].mxu1 }
 0x163   :  { %v399_v14 = vpop.f32.mrb[2].mxu1 }
 0x164   :  { %v1064_v15 = vpop.f32.mrb[3].mxu1 }
 0x165   :  { %v878_v15 = vadd.f32 %v120_v37, %v118_v33 }
 0x181   :  { %v614_v0 = vpop.f32.mrb[4].mxu1 }
 0x182   :  { %v615_v19 = vadd.f32 %v614_v0, %v396_v12  ;;  %v1083_v20 = vpop.f32.mrb[5].mxu1  ;;  %v877_v12 = vadd.f32 %v119_v34, %v117_v32 }
 0x183   :  { %v617_v21 = vpop.f32.mrb[6].mxu1 }
 0x184   :  { %v640_v22 = vadd.f32 %v634_v18, %v615_v19  ;;  %v618_v23 = vadd.f32 %v617_v21, %v399_v14  ;;  %v1084_v24 = vpop.f32.mrb[7].mxu1  ;;  %v571_v30 = vpop.f32.mrb[0].mxu0 }
 0x185   :  { %v638_v35 = vadd.f32 %v626_v9, %v571_v30  ;;  %v573_v36 = vpop.f32.mrb[1].mxu0 }
 0x186   :  { %v644_v25 = vmul.f32 0.5, %v640_v22  ;;  %v643_v26 = vadd.f32 %v634_v18, %v618_v23  ;;  %v639_v40 = vadd.f32 %v630_v11, %v573_v36  ;;  %v575_v42 = vpop.f32.mrb[2].mxu0 }
 0x187   :  { %v641_v43 = vadd.f32 %v626_v9, %v575_v42  ;;  %v577_v44 = vpop.f32.mrb[3].mxu0  ;;  %v891_v53 = vmul.f32 0.5, %v638_v35 }
 0x188   :  { %1227 = vtanh.f32 %v644_v25  ;;  %v645_v27 = vmul.f32 0.5, %v643_v26  ;;  %v642_v46 = vadd.f32 %v630_v11, %v577_v44  ;;  %v879_v52 = vmul.f32 0.5, %v639_v40 }
 0x189   :  { %v892_v17 = vmul.f32 0.5, %v641_v43 }
 0x18a   :  { %1229 = vtanh.f32 %v645_v27  ;;  %v880_v54 = vmul.f32 0.5, %v642_v46 }
 0x18b   :  { %1231 = vtanh.f32 %v879_v52 }
 0x18c   :  { %1233 = vtanh.f32 %v891_v53 }
 0x18d   :  { %1235 = vtanh.f32 %v880_v54 }
 0x18e   :  { %1237 = vtanh.f32 %v892_v17 }
 0x192   :  { %v1228_v28 = vpop.eup %1227 }
 0x193   :  { %v648_v29 = vadd.f32 1.0, %v1228_v28 }
 0x194   :  { %v1230_v31 = vpop.eup %1229 }
 0x195   :  { %v650_v38 = vmul.f32 0.5, %v648_v29  ;;  %v649_v39 = vadd.f32 1.0, %v1230_v31  ;;  %v1232_v4 = vpop.eup %1231 }
 0x196   :  { %v1234_v6 = vpop.eup %1233  ;;  %v883_v8 = vadd.f32 1.0, %v1232_v4 }
 0x197   :  { %v651_v45 = vmul.f32 0.5, %v649_v39  ;;  %v652_v47 = vmul.f32 %v650_v38, %v117_v32  ;;  %v655_v48 = vmul.f32 %v650_v38, %v119_v34  ;;  %v1236_v7 = vpop.eup %1235  ;;  %v895_v10 = vadd.f32 1.0, %v1234_v6 }
 0x198   :  { %v1238_v9 = vpop.eup %1237  ;;  %v884_v11 = vadd.f32 1.0, %v1236_v7  ;;  %v885_v13 = vmul.f32 0.5, %v883_v8 }
 0x199   :  { %v653_v49 = vmul.f32 %v651_v45, %v118_v33  ;;  %v656_v50 = vmul.f32 %v651_v45, %v120_v37  ;;  %v896_v14 = vadd.f32 1.0, %v1238_v9  ;;  %v897_v16 = vmul.f32 0.5, %v895_v10 }
 0x19a   :  { %v886_v18 = vmul.f32 0.5, %v884_v11  ;;  %v887_v19 = vmul.f32 %v885_v13, %v877_v12 }
 0x19b   :  { %v657_v51 = vpack.c.bf16 %v656_v50, %v655_v48  ;;  %v654_v41 = vpack.c.bf16 %v653_v49, %v652_v47  ;;  %v898_v20 = vmul.f32 0.5, %v896_v14 }
 0x19c   :  { %v888_v23 = vmul.f32 %v886_v18, %v878_v15 }
 0x19d   :  { %1102 = vmatmul.mubr.bf16.vlgmr.msra.gmra.mrb[4].mxu0 %v657_v51  ;;  %1122 = vmatmul.mubr.bf16.vlgmr.msra.gmra.mrb[8].mxu1 %v654_v41 }
 0x270   :  { %v772_v55 = vpop.f32.mrb[4].mxu0  ;;  %v861_v56 = vpop.f32.mrb[8].mxu1 }
 0x271   :  { %v862_v58 = vadd.f32 %v861_v56, %v772_v55  ;;  %v1103_v59 = vpop.f32.mrb[5].mxu0  ;;  %v1123_v60 = vpop.f32.mrb[9].mxu1 }
 0x272   :  { %v775_v61 = vpop.f32.mrb[6].mxu0  ;;  %v864_v62 = vpop.f32.mrb[10].mxu1 }
 0x273   :  { %v875_v63 = vadd.f32 %v999_v57, %v862_v58  ;;  %v865_v1 = vadd.f32 %v864_v62, %v775_v61  ;;  %v1104_v2 = vpop.f32.mrb[7].mxu0  ;;  %v1124_v3 = vpop.f32.mrb[11].mxu1 }
 0x275   :  { %1239 = vtanh.f32 %v875_v63  ;;  %v876_v5 = vadd.f32 %v999_v57, %v865_v1 }
 0x277   :  { %1241 = vtanh.f32 %v876_v5 }
 0x27f   :  { %v1240_v0 = vpop.eup %1239 }
 0x280   :  { %v899_v21 = vmul.f32 %v1240_v0, %v897_v16 }
 0x281   :  { %v1242_v22 = vpop.eup %1241 }
 0x282   :  { %v900_v24 = vmul.f32 %v1242_v22, %v898_v20  ;;  %v901_v25 = vadd.f32 %v899_v21, %v887_v19 }
 0x284   :  { %v902_v26 = vadd.f32 %v900_v24, %v888_v23 }
 0x286   :  { %v1007_v27 = vpack.c.bf16 %v902_v26, %v901_v25 }
 0x288   :  { %1008 = vst [vmem:[#allocation13] sm:$0xff] %v1007_v27  }
 0x289   :  { %1386 = shalt.err (!%p1383_p10)
}
 0x28a   :  { %s1387_s21 = scalar_lea.hbm %s1639_s8, 128 }
 0x28b   :  { %p1388_p11 = scmp.ne.s32.totalorder %s1639_s8, %s1387_s21  ;;  %p1391_p12 = scmp.lt.u32.totalorder %s1387_s21, %s1639_s8 }
 0x28d   :  { %p1393_p13 = pnand %p1391_p12, %p1388_p11 }
 0x28f   :  { %1396 = shalt.err (!%p1393_p13)
}
 0x290   :  { %924 = dma.vmem_to_hbm [thread:$0]  %s919_s14, 128, %s1639_s8, [#allocation4], %s1408_s15, %s1408_s15, %s1409_s16  }
 0x291   :  { %1405 = dma.done.wait [#allocation4], 128  }
 0x292   :  { %1406 = vsyncadd [#allocation4], 4294967168 }
 0x293   :  { %928 = vsyncpa [#allocation3], 1 }
 0x294   :  { %929 = vsyncpa [#allocation6], 1 }
 0x295   :  { %930 = vsyncpa [#allocation9], 1 }
 0x296   :  { %931 = vsyncpa [#allocation12], 1 }
 0x297   :  { %932 = vsyncpa [#allocation4], 1 }

</bundles_post_ra>
